<compile_context>
chip_gen: v5e
topology: v5e:2x2
jax: 0.10.0
libtpu: 0.0.40
codegen_flags: <defaults>
</compile_context>

<pallas_src>
import jax
import jax.numpy as jnp
from jax.experimental import pallas as pl
from jax.experimental.pallas import tpu as pltpu

IN_FEATURES = 784
OUT_FEATURES = 20
N_PAD = 128            # lane-dense padded class axis (one full vreg lane width)
NEG_LARGE = -1e30      # mask value for padded classes (kept finite; exp -> 0)


def fcnet_kernel(x_ref, w1_ref, b1_ref, out_ref):
    # x_ref  : (TILE_B, 784)   f32 or bf16
    # w1_ref : (784, 128)      same dtype as x (transposed + N-padded weight)
    # b1_ref : (1, 128)        f32 (N-padded bias)
    # out_ref: (TILE_B, 128)   f32 (lane-dense; wrapper slices [:, :20])
    x = x_ref[...]
    w = w1_ref[...]
    b = b1_ref[...]

    # fc1: MXU matmul with f32 accumulation, f32 epilogue.
    h = jnp.dot(x, w, preferred_element_type=jnp.float32) + b

    # relu  (dropout = eval-mode identity; spec's second relu is a no-op)
    h = jnp.maximum(h, 0.0)

    # Exclude padded lanes (>= 20) from the softmax.
    lane = jax.lax.broadcasted_iota(jnp.int32, h.shape, dimension=1)
    h = jnp.where(lane < OUT_FEATURES, h, NEG_LARGE)

    # Numerically stable log_softmax over the class axis.
    m = jnp.max(h, axis=1, keepdims=True)
    shifted = h - m
    lse = jnp.log(jnp.sum(jnp.exp(shifted), axis=1, keepdims=True))
    out_ref[...] = shifted - lse


def prepare_params(w1, b1, dtype=jnp.float32):
    """One-time repack of fc1 params: transpose + pad class axis to 128 lanes.

    Call once at model init (outside the jitted step), not per forward call.
    w1: (20, 784) PyTorch-layout weight; b1: (20,) bias.
    Returns w1_pad (784, 128) in `dtype`, b1_pad (1, 128) f32.
    """
    w1_t = jnp.transpose(w1).astype(dtype)                         # (784, 20)
    w1_pad = jnp.zeros((IN_FEATURES, N_PAD), dtype=dtype)
    w1_pad = w1_pad.at[:, :OUT_FEATURES].set(w1_t)
    b1_pad = jnp.zeros((1, N_PAD), dtype=jnp.float32)
    b1_pad = b1_pad.at[0, :OUT_FEATURES].set(b1.astype(jnp.float32))
    return w1_pad, b1_pad


def fcnet_forward(x_nchw, w1_pad, b1_pad, *, tile_b=1024):
    """x_nchw: (B, 1, 28, 28); w1_pad/b1_pad from prepare_params.

    tile_b: batch tile (multiple of 8 recommended; ~1024 is a good default,
    larger on v7x where HBM is faster and the working set still fits VMEM).
    """
    B = x_nchw.shape[0]
    x_dtype = w1_pad.dtype
    x_flat = x_nchw.reshape(B, -1).astype(x_dtype)                 # (B, 784)

    tb = min(tile_b, B)
    grid = (pl.cdiv(B, tb),)

    x_bytes = jnp.dtype(x_dtype).itemsize
    cost = pl.CostEstimate(
        flops=2 * B * IN_FEATURES * N_PAD,
        transcendentals=B * N_PAD,
        bytes_accessed=(B * IN_FEATURES * x_bytes            # x stream
                        + IN_FEATURES * N_PAD * x_bytes      # resident weight
                        + N_PAD * 4                          # bias
                        + B * N_PAD * 4),                    # output
    )

    out_pad = pl.pallas_call(
        fcnet_kernel,
        out_shape=jax.ShapeDtypeStruct((B, N_PAD), jnp.float32),
        grid_spec=pltpu.PrefetchScalarGridSpec(
            num_scalar_prefetch=0,
            grid=grid,
            in_specs=[
                pl.BlockSpec((tb, IN_FEATURES), lambda i: (i, 0)),   # x tile
                pl.BlockSpec((IN_FEATURES, N_PAD), lambda i: (0, 0)),  # resident W
                pl.BlockSpec((1, N_PAD), lambda i: (0, 0)),            # resident b
            ],
            out_specs=pl.BlockSpec((tb, N_PAD), lambda i: (i, 0)),
        ),
        compiler_params=pltpu.CompilerParams(
            dimension_semantics=("parallel",),   # lets v7x shard over 2 TCs
        ),
        cost_estimate=cost,
    )(x_flat, w1_pad, b1_pad)

    # Slice away the padded classes (cheap XLA slice).
    return out_pad[:, :OUT_FEATURES]


def reference_forward(x_nchw, w1, b1, dtype=jnp.float32):
    """Pure-JAX reference (matching input dtype) for correctness checks."""
    B = x_nchw.shape[0]
    x = x_nchw.reshape(B, -1).astype(dtype)
    w_t = jnp.transpose(w1).astype(dtype)
    h = jnp.dot(x, w_t, preferred_element_type=jnp.float32) + b1.astype(jnp.float32)
    h = jnp.maximum(h, 0.0)
    return jax.nn.log_softmax(h, axis=1)


if __name__ == "__main__":
    key = jax.random.PRNGKey(0)
    k_x, k_w1, k_b1, k_x2 = jax.random.split(key, 4)

    # PyTorch Linear-style uniform init bound.
    bound = 1.0 / jnp.sqrt(jnp.float32(IN_FEATURES))
    w1 = jax.random.uniform(k_w1, (OUT_FEATURES, IN_FEATURES),
                            minval=-bound, maxval=bound, dtype=jnp.float32)
    b1 = jax.random.uniform(k_b1, (OUT_FEATURES,),
                            minval=-bound, maxval=bound, dtype=jnp.float32)

    # Params repacked once (hoisted off the forward path).
    w1_pad_f32, b1_pad = prepare_params(w1, b1, dtype=jnp.float32)
    w1_pad_bf16, _ = prepare_params(w1, b1, dtype=jnp.bfloat16)

    # --- f32 path, small batch (strict check) ---
    x = jax.random.normal(k_x, (2, 1, 28, 28), dtype=jnp.float32)
    out = jax.block_until_ready(fcnet_forward(x, w1_pad_f32, b1_pad))
    ref = reference_forward(x, w1, b1, dtype=jnp.float32)
    assert out.shape == (2, OUT_FEATURES)
    assert jnp.allclose(out, ref, atol=1e-5, rtol=1e-5), "f32 mismatch vs reference"

    # --- multi-step grid (exercises batch tiling / pipelining), B=96, tile=32 ---
    x2 = jax.random.normal(k_x2, (96, 1, 28, 28), dtype=jnp.float32)
    out2 = jax.block_until_ready(fcnet_forward(x2, w1_pad_f32, b1_pad, tile_b=32))
    ref2 = reference_forward(x2, w1, b1, dtype=jnp.float32)
    assert out2.shape == (96, OUT_FEATURES)
    assert jnp.allclose(out2, ref2, atol=1e-5, rtol=1e-5), "tiled f32 mismatch"

    # --- bf16 x/w streaming path (f32 accumulate + f32 epilogue) ---
    out_bf16 = jax.block_until_ready(fcnet_forward(x, w1_pad_bf16, b1_pad))
    ref_bf16 = reference_forward(x, w1, b1, dtype=jnp.bfloat16)
    assert out_bf16.shape == (2, OUT_FEATURES)
    assert jnp.allclose(out_bf16, ref_bf16, atol=5e-3, rtol=5e-3), "bf16 mismatch"

    print("KERNEL_OK")
</pallas_src>

<mosaic_0001>
module attributes {stable_mosaic.version = 11 : i64} {
  func.func @fcnet_kernel(%arg0: i32, %arg1: memref<2x784xf32, #tpu.memory_space<vmem>>, %arg2: memref<784x128xf32, #tpu.memory_space<vmem>>, %arg3: memref<1x128xf32, #tpu.memory_space<vmem>>, %arg4: memref<2x128xf32, #tpu.memory_space<vmem>>) attributes {dimension_semantics = [#tpu.dimension_semantics<parallel>], iteration_bounds = array<i64: 1>, scalar_prefetch = 0 : i64, scratch_operands = 0 : i64, tpu.core_type = #tpu.core_type<tc>, window_params = [{transform_indices = @transform_0, window_bounds = array<i64: 2, 784>}, {pipeline_mode = #tpu.pipeline_mode<synchronous>, transform_indices = @transform_1, window_bounds = array<i64: 784, 128>}, {pipeline_mode = #tpu.pipeline_mode<synchronous>, transform_indices = @transform_2, window_bounds = array<i64: 1, 128>}, {transform_indices = @transform_3, window_bounds = array<i64: 2, 128>}]} {
    %c0 = arith.constant 0 : index
    %c0_0 = arith.constant 0 : index
    %0 = vector.load %arg1[%c0, %c0_0] : memref<2x784xf32, #tpu.memory_space<vmem>>, vector<2x784xf32>
    %c0_1 = arith.constant 0 : index
    %c0_2 = arith.constant 0 : index
    %1 = vector.load %arg2[%c0_1, %c0_2] : memref<784x128xf32, #tpu.memory_space<vmem>>, vector<784x128xf32>
    %c0_3 = arith.constant 0 : index
    %c0_4 = arith.constant 0 : index
    %2 = vector.load %arg3[%c0_3, %c0_4] : memref<1x128xf32, #tpu.memory_space<vmem>>, vector<1x128xf32>
    %cst = arith.constant dense<0.000000e+00> : vector<2x128xf32>
    %3 = tpu.matmul %0, %1, %cst {dimension_numbers = #tpu.dot_dimension_numbers<[1], [0], [0], [1], [0, 0, 1, 1], [], []>} : vector<2x784xf32>, vector<784x128xf32>, vector<2x128xf32> -> vector<2x128xf32>
    %4 = vector.broadcast %2 : vector<1x128xf32> to vector<2x128xf32>
    %5 = arith.addf %3, %4 : vector<2x128xf32>
    %cst_5 = arith.constant 0.000000e+00 : f32
    %6 = vector.broadcast %cst_5 : f32 to vector<2x128xf32>
    %7 = arith.maximumf %5, %6 : vector<2x128xf32>
    %8 = tpu.iota {dimensions = array<i32: 1>} : vector<2x128xi32>
    %c20_i32 = arith.constant 20 : i32
    %9 = vector.broadcast %c20_i32 : i32 to vector<2x128xi32>
    %10 = arith.cmpi slt, %8, %9 : vector<2x128xi32>
    %cst_6 = arith.constant -1.000000e+30 : f32
    %11 = vector.broadcast %cst_6 : f32 to vector<2x128xf32>
    %12 = arith.select %10, %7, %11 : vector<2x128xi1>, vector<2x128xf32>
    %cst_7 = arith.constant dense<0xFF800000> : vector<2xf32>
    %13 = vector.multi_reduction <maximumf>, %12, %cst_7 [1] : vector<2x128xf32> to vector<2xf32>
    %14 = vector.shape_cast %13 : vector<2xf32> to vector<2x1xf32>
    %15 = vector.broadcast %14 : vector<2x1xf32> to vector<2x128xf32>
    %16 = arith.subf %12, %15 : vector<2x128xf32>
    %17 = math.exp %16 : vector<2x128xf32>
    %cst_8 = arith.constant dense<0.000000e+00> : vector<2xf32>
    %18 = vector.multi_reduction <add>, %17, %cst_8 [1] : vector<2x128xf32> to vector<2xf32>
    %19 = vector.shape_cast %18 : vector<2xf32> to vector<2x1xf32>
    %20 = math.log %19 : vector<2x1xf32>
    %21 = vector.broadcast %20 : vector<2x1xf32> to vector<2x128xf32>
    %22 = arith.subf %16, %21 : vector<2x128xf32>
    %c0_9 = arith.constant 0 : index
    %c0_10 = arith.constant 0 : index
    %23 = vector.load %arg4[%c0_9, %c0_10] : memref<2x128xf32, #tpu.memory_space<vmem>>, vector<2x128xf32>
    tpu.vector_store %arg4[%c0_9, %c0_10], %22 {strides = array<i32>} : memref<2x128xf32, #tpu.memory_space<vmem>>, vector<2x128xf32>,
    return
  }
  func.func @transform_0(%arg0: i32) -> (i32, i32) {
    %c0_i32 = arith.constant 0 : i32
    %c0_i32_0 = arith.constant 0 : i32
    return %arg0, %c0_i32 : i32, i32
  }
  func.func @transform_1(%arg0: i32) -> (i32, i32) {
    %c0_i32 = arith.constant 0 : i32
    %c0_i32_0 = arith.constant 0 : i32
    %c0_i32_1 = arith.constant 0 : i32
    return %c0_i32, %c0_i32_0 : i32, i32
  }
  func.func @transform_2(%arg0: i32) -> (i32, i32) {
    %c0_i32 = arith.constant 0 : i32
    %c0_i32_0 = arith.constant 0 : i32
    %c0_i32_1 = arith.constant 0 : i32
    return %c0_i32, %c0_i32_0 : i32, i32
  }
  func.func @transform_3(%arg0: i32) -> (i32, i32) {
    %c0_i32 = arith.constant 0 : i32
    %c0_i32_0 = arith.constant 0 : i32
    return %arg0, %c0_i32 : i32, i32
  }
}

</mosaic_0001>

<bundles_post_ra>
// kernel: tpu_custom_call.1
= control target key start
LH: loop header
LB: loop body
LE: loop exit
PB: predicated region body
PF: predicated region fallthrough
CT: control target
= control target key end

     0   :  { %8 = vsyncpa [#allocation3], 0  ;;  %s473_s0 = inlined_call_operand.hbm [shape: f32[2,784], index: 0, kind: input, shape index: {}]   ;;  %s474_s1 = inlined_call_operand.hbm [shape: f32[784,128], index: 1, kind: input, shape index: {}]   ;;  %s475_s2 = inlined_call_operand.vmem [shape: f32[1,128], index: 2, kind: input, shape index: {}]   ;;  %s476_s3 = inlined_call_operand.hbm [shape: f32[2,128], index: 3, kind: output, shape index: {}]  }
   0x1   :  { %9 = vsyncpa [#allocation6], 0 }
   0x2   :  { %10 = vsyncpa [#allocation4], 0  ;;  %s16_s14 = sshll.u32 %s473_s0, 4  ;;  %s436_s15 = smov [#allocation2]   ;;  %s17_s14 = int_to_ptr.hbm [resolvable:$true] %s16_s14 }
   0x3   :  { %s18_s16 = sshll.u32 %s436_s15, 4  ;;  %s26_s19 = sshll.u32 %s474_s1, 4  ;;  %s19_s16 = int_to_ptr.vmem [resolvable:$true] %s18_s16  ;;  %s27_s19 = int_to_ptr.hbm [resolvable:$true] %s26_s19 }
   0x4   :  { %21 = dma.hbm_to_vmem [thread:$0]  %s17_s14, 224, %s19_s16, [#allocation3]  }
   0x5   :  { %s437_s20 = smov [#allocation5]   ;;  %s438_s22 = smov 128  }
   0x6   :  { %s28_s21 = sshll.u32 %s437_s20, 4  ;;  %s439_s23 = smov 8   ;;  %s29_s21 = int_to_ptr.vmem [resolvable:$true] %s28_s21 }
   0x7   :  { %34 = dma.hbm_to_vmem [thread:$0]  %s27_s19, 12544, %s29_s21, [#allocation6], %s438_s22, %s438_s22, %s439_s23  }
   0x8   :  { %430 = dma.done.wait [#allocation3], 224  }
   0x9   :  { %431 = vsyncadd [#allocation3], 4294967072 }
   0xa   :  { %432 = dma.done.wait [#allocation6], 12544  }
   0xb   :  { %433 = vsyncadd [#allocation6], 4294954752  ;;  %v62_v0 = vld [vmem:[#allocation5 + $0x78] sm:$0xff]  ;;  %v61_v1 = vld [vmem:[#allocation5 + $0x70] sm:$0xff]  ;;  %vm167_vm0 = vcmask 130048   ;;  %vm315_vm2 = vcmask 1041408  }
   0xc   :  { %v78_v2 = vld [vmem:[#allocation5 + $0xf8] sm:$0xff]  ;;  %170 = vmatpush.msra.mxu0 %v62_v0  ;;  %v77_v3 = vld [vmem:[#allocation5 + $0xf0] sm:$0xff]  ;;  %v60_v4 = vld [vmem:[#allocation5 + $0x68] sm:$0xff]  ;;  %s336_s27 = sshll.u32 %s476_s3, 4  ;;  %s337_s27 = int_to_ptr.hbm [resolvable:$true] %s336_s27 }
   0xd   :  { %190 = vmatpush.msra.mxu1 %v78_v2  ;;  %v76_v5 = vld [vmem:[#allocation5 + $0xe8] sm:$0xff]  ;;  %v59_v6 = vld [vmem:[#allocation5 + $0x60] sm:$0xff]  ;;  %v58_v8 = vld [vmem:[#allocation5 + $0x58] sm:$0xff] }
   0xe   :  { %171 = vmatpush.msra.mxu0 %v61_v1  ;;  %v75_v7 = vld [vmem:[#allocation5 + $0xe0] sm:$0xff]  ;;  %v74_v9 = vld [vmem:[#allocation5 + $0xd8] sm:$0xff]  ;;  %v57_v10 = vld [vmem:[#allocation5 + $0x50] sm:$0xff] }
   0xf   :  { %191 = vmatpush.msra.mxu1 %v77_v3  ;;  %v94_v11 = vld [vmem:[#allocation5 + $0x178] sm:$0xff]  ;;  %v73_v12 = vld [vmem:[#allocation5 + $0xd0] sm:$0xff]  ;;  %v92_v15 = vld [vmem:[#allocation5 + $0x168] sm:$0xff] }
  0x10   :  { %172 = vmatpush.msra.mxu0 %v60_v4  ;;  %210 = vmatpush.msra.mxu2 %v94_v11  ;;  %v93_v13 = vld [vmem:[#allocation5 + $0x170] sm:$0xff]  ;;  %v110_v14 = vld [vmem:[#allocation5 + $0x1f8] sm:$0xff]  ;;  %v56_v17 = vld [vmem:[#allocation5 + $0x48] sm:$0xff] }
  0x11   :  { %192 = vmatpush.msra.mxu1 %v76_v5  ;;  %v109_v16 = vld [vmem:[#allocation5 + $0x1f0] sm:$0xff]  ;;  %v72_v18 = vld [vmem:[#allocation5 + $0xc8] sm:$0xff]  ;;  %230 = vmatpush.msra.mxu3 %v110_v14  ;;  %v91_v19 = vld [vmem:[#allocation5 + $0x160] sm:$0xff] }
  0x12   :  { %173 = vmatpush.msra.mxu0 %v59_v6  ;;  %211 = vmatpush.msra.mxu2 %v93_v13  ;;  %v108_v20 = vld [vmem:[#allocation5 + $0x1e8] sm:$0xff]  ;;  %v55_v21 = vld [vmem:[#allocation5 + $0x40] sm:$0xff]  ;;  %v90_v23 = vld [vmem:[#allocation5 + $0x158] sm:$0xff] }
  0x13   :  { %193 = vmatpush.msra.mxu1 %v75_v7  ;;  %v71_v22 = vld [vmem:[#allocation5 + $0xc0] sm:$0xff]  ;;  %231 = vmatpush.msra.mxu3 %v109_v16  ;;  %v54_v25 = vld [vmem:[#allocation5 + $0x38] sm:$0xff]  ;;  %v89_v27 = vld [vmem:[#allocation5 + $0x150] sm:$0xff] }
  0x14   :  { %174 = vmatpush.msra.mxu0 %v58_v8  ;;  %212 = vmatpush.msra.mxu2 %v92_v15  ;;  %v107_v24 = vld [vmem:[#allocation5 + $0x1e0] sm:$0xff]  ;;  %v70_v26 = vld [vmem:[#allocation5 + $0xb8] sm:$0xff]  ;;  %v53_v29 = vld [vmem:[#allocation5 + $0x30] sm:$0xff] }
  0x15   :  { %194 = vmatpush.msra.mxu1 %v74_v9  ;;  %232 = vmatpush.msra.mxu3 %v108_v20  ;;  %v106_v28 = vld [vmem:[#allocation5 + $0x1d8] sm:$0xff]  ;;  %v69_v30 = vld [vmem:[#allocation5 + $0xb0] sm:$0xff]  ;;  %v88_v31 = vld [vmem:[#allocation5 + $0x148] sm:$0xff] }
  0x16   :  { %175 = vmatpush.msra.mxu0 %v57_v10  ;;  %213 = vmatpush.msra.mxu2 %v91_v19  ;;  %v105_v32 = vld [vmem:[#allocation5 + $0x1d0] sm:$0xff]  ;;  %v52_v33 = vld [vmem:[#allocation5 + $0x28] sm:$0xff]  ;;  %v87_v35 = vld [vmem:[#allocation5 + $0x140] sm:$0xff] }
  0x17   :  { %195 = vmatpush.msra.mxu1 %v73_v12  ;;  %233 = vmatpush.msra.mxu3 %v107_v24  ;;  %v68_v34 = vld [vmem:[#allocation5 + $0xa8] sm:$0xff]  ;;  %v51_v37 = vld [vmem:[#allocation5 + $0x20] sm:$0xff]  ;;  %v86_v39 = vld [vmem:[#allocation5 + $0x138] sm:$0xff] }
  0x18   :  { %176 = vmatpush.msra.mxu0 %v56_v17  ;;  %214 = vmatpush.msra.mxu2 %v90_v23  ;;  %v104_v36 = vld [vmem:[#allocation5 + $0x1c8] sm:$0xff]  ;;  %v67_v38 = vld [vmem:[#allocation5 + $0xa0] sm:$0xff]  ;;  %v50_v41 = vld [vmem:[#allocation5 + $0x18] sm:$0xff] }
  0x19   :  { %196 = vmatpush.msra.mxu1 %v72_v18  ;;  %234 = vmatpush.msra.mxu3 %v106_v28  ;;  %v103_v40 = vld [vmem:[#allocation5 + $0x1c0] sm:$0xff]  ;;  %v66_v42 = vld [vmem:[#allocation5 + $0x98] sm:$0xff]  ;;  %v85_v43 = vld [vmem:[#allocation5 + $0x130] sm:$0xff] }
  0x1a   :  { %177 = vmatpush.msra.mxu0 %v55_v21  ;;  %215 = vmatpush.msra.mxu2 %v89_v27  ;;  %v102_v44 = vld [vmem:[#allocation5 + $0x1b8] sm:$0xff]  ;;  %v49_v45 = vld [vmem:[#allocation5 + $0x10] sm:$0xff]  ;;  %v84_v47 = vld [vmem:[#allocation5 + $0x128] sm:$0xff] }
  0x1b   :  { %197 = vmatpush.msra.mxu1 %v71_v22  ;;  %235 = vmatpush.msra.mxu3 %v105_v32  ;;  %v65_v46 = vld [vmem:[#allocation5 + $0x90] sm:$0xff]  ;;  %v48_v49 = vld [vmem:[#allocation5 + $0x8] sm:$0xff]  ;;  %v83_v51 = vld [vmem:[#allocation5 + $0x120] sm:$0xff] }
  0x1c   :  { %178 = vmatpush.msra.mxu0 %v54_v25  ;;  %216 = vmatpush.msra.mxu2 %v88_v31  ;;  %v101_v48 = vld [vmem:[#allocation5 + $0x1b0] sm:$0xff]  ;;  %v64_v50 = vld [vmem:[#allocation5 + $0x88] sm:$0xff]  ;;  %v47_v53 = vld [vmem:[#allocation5] sm:$0xff] }
  0x1d   :  { %198 = vmatpush.msra.mxu1 %v70_v26  ;;  %236 = vmatpush.msra.mxu3 %v104_v36  ;;  %v100_v52 = vld [vmem:[#allocation5 + $0x1a8] sm:$0xff]  ;;  %v63_v54 = vld [vmem:[#allocation5 + $0x80] sm:$0xff]  ;;  %v45_v55 = vld [vmem:[#allocation2] sm:$0xff] }
  0x1e   :  { %179 = vmatpush.msra.mxu0 %v53_v29  ;;  %217 = vmatpush.msra.mxu2 %v87_v35  ;;  %v126_v56 = vld [vmem:[#allocation5 + $0x278] sm:$0xff]  ;;  %151 = vst [vmem:[#allocation1] ss:$4 sm:$0xff] %v45_v55  ;;  %v99_v59 = vld [vmem:[#allocation5 + $0x1a0] sm:$0xff]  ;;  %v125_v60 = vld [vmem:[#allocation5 + $0x270] sm:$0xff] }
  0x1f   :  { %199 = vmatpush.msra.mxu1 %v69_v30  ;;  %237 = vmatpush.msra.mxu3 %v103_v40  ;;  %v142_v57 = vld [vmem:[#allocation5 + $0x2f8] sm:$0xff]  ;;  %v141_v61 = vld [vmem:[#allocation5 + $0x2f0] sm:$0xff]  ;;  %v124_v1 = vld [vmem:[#allocation5 + $0x268] sm:$0xff] }
  0x20   :  { %180 = vmatpush.msra.mxu0 %v52_v33  ;;  %218 = vmatpush.msra.mxu2 %v86_v39  ;;  %v82_v58 = vld [vmem:[#allocation5 + $0x118] sm:$0xff]  ;;  %v81_v62 = vld [vmem:[#allocation5 + $0x110] sm:$0xff]  ;;  %v140_v2 = vld [vmem:[#allocation5 + $0x2e8] sm:$0xff] }
  0x21   :  { %200 = vmatpush.msra.mxu1 %v68_v34  ;;  %238 = vmatpush.msra.mxu3 %v102_v44  ;;  %v98_v63 = vld [vmem:[#allocation5 + $0x198] sm:$0xff]  ;;  %v80_v3 = vld [vmem:[#allocation5 + $0x108] sm:$0xff]  ;;  %v97_v4 = vld [vmem:[#allocation5 + $0x190] sm:$0xff] }
  0x22   :  { %181 = vmatpush.msra.mxu0 %v51_v37  ;;  %219 = vmatpush.msra.mxu2 %v85_v43  ;;  %v46_v0 = vld [vmem:[#allocation2 + $0x8] sm:$0x3f]  ;;  %v123_v5 = vld [vmem:[#allocation5 + $0x260] sm:$0xff]  ;;  %v96_v8 = vld [vmem:[#allocation5 + $0x188] sm:$0xff] }
  0x23   :  { %201 = vmatpush.msra.mxu1 %v67_v38  ;;  %239 = vmatpush.msra.mxu3 %v101_v48  ;;  %153 = vst [vmem:[#allocation1 + $0x20] ss:$4 sm:$0xff] %v46_v0  ;;  %v139_v6 = vld [vmem:[#allocation5 + $0x2e0] sm:$0xff]  ;;  %v122_v9 = vld [vmem:[#allocation5 + $0x258] sm:$0xff]  ;;  %v121_v13 = vld [vmem:[#allocation5 + $0x250] sm:$0xff] }
  0x24   :  { %182 = vmatpush.msra.mxu0 %v50_v41  ;;  %220 = vmatpush.msra.mxu2 %v84_v47  ;;  %v79_v7 = vld [vmem:[#allocation5 + $0x100] sm:$0xff]  ;;  %v138_v10 = vld [vmem:[#allocation5 + $0x2d8] sm:$0xff]  ;;  %v137_v14 = vld [vmem:[#allocation5 + $0x2d0] sm:$0xff] }
  0x25   :  { %202 = vmatpush.msra.mxu1 %v66_v42  ;;  %240 = vmatpush.msra.mxu3 %v100_v52  ;;  %v156_v11 = vld.sshfl [vmem:[#allocation1 + $0x10] sm:$0xff pattern:$0x73625140]  ;;  %v144_v15 = vld [vmem:[#allocation5 + $0x308] sm:$0xff]  ;;  %v117_v27 = vld [vmem:[#allocation5 + $0x230] sm:$0xff]  ;;  %v311_v52 = vlaneseq }
  0x26   :  { %183 = vmatpush.msra.mxu0 %v49_v45  ;;  %221 = vmatpush.msra.mxu2 %v83_v51  ;;  %v95_v12 = vld [vmem:[#allocation5 + $0x180] sm:$0xff]  ;;  %v154_v16 = vld.sshfl [vmem:[#allocation1] sm:$0xff pattern:$0x73625140]  ;;  %v118_v24 = vld [vmem:[#allocation5 + $0x238] sm:$0xff] }
  0x27   :  { %203 = vmatpush.msra.mxu1 %v65_v46  ;;  %241 = vmatpush.msra.mxu3 %v99_v59  ;;  %v120_v17 = vld [vmem:[#allocation5 + $0x248] sm:$0xff]  ;;  %v155_v20 = vld.sshfl [vmem:[#allocation1 + $0x8] sm:$0xff pattern:$0x73625140]  ;;  %v119_v21 = vld [vmem:[#allocation5 + $0x240] sm:$0xff] }
  0x28   :  { %184 = vmatpush.msra.mxu0 %v48_v49  ;;  %222 = vmatpush.msra.mxu2 %v82_v58  ;;  %v136_v18 = vld [vmem:[#allocation5 + $0x2c8] sm:$0xff]  ;;  %v135_v22 = vld [vmem:[#allocation5 + $0x2c0] sm:$0xff]  ;;  %v134_v25 = vld [vmem:[#allocation5 + $0x2b8] sm:$0xff] }
  0x29   :  { %204 = vmatpush.msra.mxu1 %v64_v50  ;;  %242 = vmatpush.msra.mxu3 %v98_v63  ;;  %v157_v19 = vld.sshfl [vmem:[#allocation1 + $0x18] sm:$0xff pattern:$0x73625140]  ;;  %v133_v28 = vld [vmem:[#allocation5 + $0x2b0] sm:$0xff]  ;;  %v114_v33 = vld [vmem:[#allocation5 + $0x218] sm:$0xff] }
  0x2a   :  { %185 = vmatpush.msra.mxu0 %v47_v53  ;;  %223 = vmatpush.msra.mxu2 %v81_v62  ;;  %v143_v23 = vld [vmem:[#allocation5 + $0x300] sm:$0xff]  ;;  %v116_v29 = vld [vmem:[#allocation5 + $0x228] sm:$0xff]  ;;  %v130_v34 = vld [vmem:[#allocation5 + $0x298] sm:$0xff] }
  0x2b   :  { %205 = vmatpush.msra.mxu1 %v63_v54  ;;  %243 = vmatpush.msra.mxu3 %v97_v4  ;;  %v160_v26 = vld.sshfl [vmem:[#allocation1 + $0x30] sm:$0xff pattern:$0x73625140]  ;;  %v132_v30 = vld [vmem:[#allocation5 + $0x2a8] sm:$0xff]  ;;  %v113_v35 = vld [vmem:[#allocation5 + $0x210] sm:$0xff] }
  0x2c   :  { %250 = vmatpush.msrb.mxu0 %v126_v56  ;;  %224 = vmatpush.msra.mxu2 %v80_v3  ;;  %v115_v31 = vld [vmem:[#allocation5 + $0x220] sm:$0xff]  ;;  %v129_v36 = vld [vmem:[#allocation5 + $0x290] sm:$0xff]  ;;  %v112_v37 = vld [vmem:[#allocation5 + $0x208] sm:$0xff] }
  0x2d   :  { %270 = vmatpush.msrb.mxu1 %v142_v57  ;;  %244 = vmatpush.msra.mxu3 %v96_v8  ;;  %v131_v32 = vld [vmem:[#allocation5 + $0x2a0] sm:$0xff]  ;;  %v128_v38 = vld [vmem:[#allocation5 + $0x288] sm:$0xff]  ;;  %v159_v42 = vld.sshfl [vmem:[#allocation1 + $0x28] sm:$0xff pattern:$0x73625140]  ;;  %v312_v57 = vand.u32 127, %v311_v52 }
  0x2e   :  { %251 = vmatpush.msrb.mxu0 %v125_v60  ;;  %225 = vmatpush.msra.mxu2 %v79_v7  ;;  %v111_v39 = vld [vmem:[#allocation5 + $0x200] sm:$0xff]  ;;  %v158_v41 = vld.sshfl [vmem:[#allocation1 + $0x20] sm:$0xff pattern:$0x73625140] }
  0x2f   :  { %271 = vmatpush.msrb.mxu1 %v141_v61  ;;  %226 = vmatmul.f32.vlgmr.msra.gmra.mxu2 %v156_v11  ;;  %v127_v40 = vld [vmem:[#allocation5 + $0x280] sm:$0xff]  ;;  %v353_v43 = vld [vmem:[%s475_s2] ss:$0 sm:$0xff]  ;;  %vm313_vm1 = vcmp.lt.s32.totalorder %v312_v57, 20  ;;  %s440_s2 = smov [#allocation7]  }
  0x30   :  { %252 = vmatpush.msrb.mxu0 %v124_v1  ;;  %245 = vmatpush.msra.mxu3 %v95_v12  ;;  %s334_s24 = sshll.u32 %s440_s2, 4  ;;  %s335_s24 = int_to_ptr.vmem [resolvable:$true] %s334_s24 }
  0x31   :  { %272 = vmatpush.msrb.mxu1 %v140_v2  ;;  %304 = vmatpush.msrb.mxu2 %v144_v15 }
  0x32   :  { %253 = vmatpush.msrb.mxu0 %v123_v5  ;;  %246 = vmatmul.f32.vlgmr.msra.gmra.mxu3 %v157_v19 }
  0x33   :  { %273 = vmatpush.msrb.mxu1 %v139_v6  ;;  %186 = vmatmul.f32.vlgmr.msra.gmra.mxu0 %v154_v16 }
  0x34   :  { %254 = vmatpush.msrb.mxu0 %v122_v9  ;;  %206 = vmatmul.f32.vlgmr.msra.gmra.mxu1 %v155_v20 }
  0x35   :  { %274 = vmatpush.msrb.mxu1 %v138_v10  ;;  %305 = vmatpush.msrb.mxu2 %v143_v23 }
  0x36   :  { %255 = vmatpush.msrb.mxu0 %v121_v13 }
  0x37   :  { %275 = vmatpush.msrb.mxu1 %v137_v14  ;;  %347 = vmatmul.msk.f32.vlgmr.msrb.gmra.mxu2 %vm167_vm0, %v160_v26 }
  0x38   :  { %256 = vmatpush.msrb.mxu0 %v120_v17 }
  0x39   :  { %276 = vmatpush.msrb.mxu1 %v136_v18 }
  0x3a   :  { %257 = vmatpush.msrb.mxu0 %v119_v21 }
  0x3b   :  { %277 = vmatpush.msrb.mxu1 %v135_v22 }
  0x3c   :  { %258 = vmatpush.msrb.mxu0 %v118_v24 }
  0x3d   :  { %278 = vmatpush.msrb.mxu1 %v134_v25 }
  0x3e   :  { %259 = vmatpush.msrb.mxu0 %v117_v27 }
  0x3f   :  { %279 = vmatpush.msrb.mxu1 %v133_v28 }
  0x40   :  { %260 = vmatpush.msrb.mxu0 %v116_v29 }
  0x41   :  { %280 = vmatpush.msrb.mxu1 %v132_v30 }
  0x42   :  { %261 = vmatpush.msrb.mxu0 %v115_v31 }
  0x43   :  { %281 = vmatpush.msrb.mxu1 %v131_v32 }
  0x44   :  { %262 = vmatpush.msrb.mxu0 %v114_v33 }
  0x45   :  { %282 = vmatpush.msrb.mxu1 %v130_v34 }
  0x46   :  { %263 = vmatpush.msrb.mxu0 %v113_v35 }
  0x47   :  { %283 = vmatpush.msrb.mxu1 %v129_v36 }
  0x48   :  { %264 = vmatpush.msrb.mxu0 %v112_v37 }
  0x49   :  { %284 = vmatpush.msrb.mxu1 %v128_v38 }
  0x4a   :  { %265 = vmatpush.msrb.mxu0 %v111_v39 }
  0x4b   :  { %285 = vmatpush.msrb.mxu1 %v127_v40  ;;  %266 = vmatmul.f32.vlgmr.msrb.gmra.mxu0 %v158_v41 }
  0x4c   :  { %286 = vmatmul.f32.vlgmr.msrb.gmra.mxu1 %v159_v42 }
  0xb0   :  { %v187_v44 = vpop.f32.mrf.mxu0 }
  0xb1   :  { %v188_v45 = vadd.f32 %v353_v43, %v187_v44  ;;  %v207_v46 = vpop.f32.mrf.mxu1 }
  0xb2   :  { %v227_v48 = vpop.f32.mrf.mxu2 }
  0xb3   :  { %v208_v47 = vadd.f32 %v207_v46, %v188_v45 }
  0xb5   :  { %v228_v49 = vadd.f32 %v227_v48, %v208_v47  ;;  %v247_v50 = vpop.f32.mrf.mxu3 }
  0xb7   :  { %v248_v51 = vadd.f32 %v247_v50, %v228_v49 }
  0xba   :  { %v307_v56 = vpop.f32.mrf.mxu2 }
  0xc8   :  { %v267_v53 = vpop.f32.mrf.mxu0 }
  0xc9   :  { %v287_v54 = vpop.f32.mrf.mxu1  ;;  %v268_v55 = vadd.f32 %v267_v53, %v248_v51 }
  0xcb   :  { %v288_v58 = vadd.f32 %v287_v54, %v268_v55 }
  0xcd   :  { %v308_v59 = vadd.f32 %v307_v56, %v288_v58 }
  0xcf   :  { %v310_v60 = vmax.f32 %v308_v59, 0.0 }
  0xd1   :  { %v314_v61 = vsel %vm313_vm1, %v310_v60, -1e+30 }
  0xd2   :  { %v316_v62 = vsel %vm315_vm2, %v314_v61, -inf }
  0xd3   :  { %317 = vmax.xlane.f32.xlu0 %v316_v62 }
 0x146   :  { %v318_v63 = vpop.xlane.xlu0 %317 }
 0x147   :  { %v319_v0 = vsub.f32 %v314_v61, %v318_v63 }
 0x149   :  { %v320_v1 = vmul.f32 1.442695, %v319_v0 }
 0x14b   :  { %354 = vpow2.f32 %v320_v1 }
 0x151   :  { %v355_v2 = vpop.eup %354 }
 0x152   :  { %v322_v3 = vsel %vm315_vm2, %v355_v2, 0.0 }
 0x153   :  { %323 = vadd.xlane.f32.xlu0 %v322_v3 }
 0x1c6   :  { %v324_v4 = vpop.xlane.xlu0 %323 }
 0x1c7   :  { %356 = vlog2.f32 %v324_v4 }
 0x1cd   :  { %v357_v5 = vpop.eup %356 }
 0x1ce   :  { %v326_v6 = vmul.f32 0.6931472, %v357_v5 }
 0x1d0   :  { %v327_v7 = vsub.f32 %v319_v0, %v326_v6 }
 0x1d2   :  { %328 = vst [vmem:[#allocation7] sm:$0x3] %v327_v7 }
 0x1d3   :  { %339 = dma.vmem_to_hbm [thread:$0]  %s335_s24, 32, %s337_s27, [#allocation4]  }
 0x1d4   :  { %434 = dma.done.wait [#allocation4], 32  }
 0x1d5   :  { %435 = vsyncadd [#allocation4], 4294967264 }
 0x1d6   :  { %344 = vsyncpa [#allocation3], 1 }
 0x1d7   :  { %345 = vsyncpa [#allocation6], 1 }
 0x1d8   :  { %346 = vsyncpa [#allocation4], 1 }

</bundles_post_ra>
